<compile_context>
chip_gen: v6e
topology: v6e:2x2x1
jax: 0.10.0
libtpu: 0.0.40
codegen_flags: <defaults>
</compile_context>

<pallas_src>
import functools

import jax
import jax.numpy as jnp
from jax.experimental import pallas as pl
from jax.experimental.pallas import tpu as pltpu


def _round_up(a, b):
    return (a + b - 1) // b * b


def _conv3x3_elu_kernel(w_ref, b_ref, x_ref, o_ref, *, C_in, C_out, H, W, BB):
    """BB batch elements: reflection-pad(1) 3x3 conv + bias + ELU.

    w_ref: (C_out, 9*C_in)  VMEM -- lane-dense weights, w[o, t*C_in + c], t = dy*3 + dx
    b_ref: (C_out, 1)       VMEM -- bias
    x_ref: (BB, C_in, H*W)  VMEM -- flattened (lane-dense) input images
    o_ref: (BB, C_out, H*W) VMEM -- flattened (lane-dense) output images
    """
    HW = H * W

    # Hoisted out of the batch loop: single bulk weight/bias loads and the
    # column-reflection masks.
    w = w_ref[...].astype(jnp.float32)             # (C_out, 9*C_in)
    bias = b_ref[...].astype(jnp.float32)          # (C_out, 1)
    col = jax.lax.broadcasted_iota(jnp.int32, (1, HW), 1) % W
    first_col = col == 0
    last_col = col == W - 1

    def col_shifts(r):
        # Each lane rotation computed exactly once (XLU slot), positive shifts.
        r_prev = pltpu.roll(r, 1, axis=1)          # r_prev[k] = r[k-1]
        r_next = pltpu.roll(r, HW - 1, axis=1)     # r_next[k] = r[k+1]
        lft = jnp.where(first_col, r_next, r_prev)   # column j-1 (col 0 reflects to 1)
        rgt = jnp.where(last_col, r_prev, r_next)    # column j+1 (col W-1 reflects to W-2)
        return lft, rgt

    for b in range(BB):   # BB is small; weights/masks stay resident across iterations
        x = x_ref[b].astype(jnp.float32)           # (C_in, HW)

        # Row-shifted images (reflection along H), built once per batch element.
        up = jnp.concatenate([x[:, W:2 * W], x[:, :HW - W]], axis=1)
        down = jnp.concatenate([x[:, W:], x[:, HW - 2 * W:HW - W]], axis=1)

        lu, ru = col_shifts(up)
        lx, rx = col_shifts(x)
        ld, rd = col_shifts(down)

        # im2col matrix, rows ordered t*C_in + c with t = dy*3 + dx.
        im2col = jnp.concatenate(
            (lu, up, ru, lx, x, rx, ld, down, rd), axis=0)       # (9*C_in, HW)

        # One MXU matmul with f32 accumulation replaces the VALU FMA chain.
        acc = jnp.dot(w, im2col, preferred_element_type=jnp.float32)   # (C_out, HW)

        y = acc + bias
        y = jnp.where(y > 0, y, jnp.exp(jnp.minimum(y, 0.0)) - 1.0)    # ELU(alpha=1)
        o_ref[b] = y.astype(o_ref.dtype)


def _pick_batch_block(B, per_batch_io_bytes, target_bytes=256 * 1024):
    """Block batch elements per grid step toward ~256 KB DMAs, but keep at least
    two grid steps when B >= 2 so both v7x TensorCores get work."""
    if B <= 1:
        return 1
    bb_cap = max(1, B // 2)
    bb = max(1, min(bb_cap, target_bytes // max(1, per_batch_io_bytes)))
    while B % bb:
        bb -= 1
    return bb


def conv_block(x, weight, bias):
    """x: (B, C_in, H, W); weight: (C_out, C_in, 3, 3); bias: (C_out,)."""
    B, C_in, H, W = x.shape
    C_out = weight.shape[0]
    assert weight.shape == (C_out, C_in, 3, 3)
    assert H >= 2 and W >= 2, "reflection padding needs H, W >= 2"
    HW = H * W

    # Lane-dense I/O layout: (B, C, H*W).
    x_flat = x.reshape(B, C_in, HW)
    # Lane-dense weights: w2d[o, t*C_in + c] = weight[o, c, dy, dx], t = dy*3 + dx.
    w2d = jnp.transpose(weight, (0, 2, 3, 1)).reshape(C_out, 9 * C_in).astype(jnp.float32)
    b2 = bias.reshape(C_out, 1).astype(jnp.float32)

    cin_p = _round_up(C_in, 8)
    cout_p = _round_up(C_out, 8)
    hw_p = _round_up(HW, 128)
    per_batch_io = (cin_p + cout_p) * hw_p * 4
    BB = _pick_batch_block(B, per_batch_io)

    kernel = functools.partial(_conv3x3_elu_kernel,
                               C_in=C_in, C_out=C_out, H=H, W=W, BB=BB)

    # VMEM budget: double-buffered I/O blocks + (grid-invariant) weights/bias +
    # in-kernel intermediates (row shifts, rolls, taps, im2col, acc/ELU),
    # capped at 48 MiB to leave headroom on v7x (64 MiB per TensorCore).
    blk_io = BB * per_batch_io
    w_bytes = cout_p * _round_up(9 * C_in, 128) * 4
    b_bytes = cout_p * 128 * 4
    live = BB * (12 * cin_p + _round_up(9 * C_in, 8) + 2 * cout_p) * hw_p * 4
    vmem_limit = 2 * blk_io + 2 * (w_bytes + b_bytes) + live + (4 << 20)
    vmem_limit = int(min(48 << 20, max(8 << 20, vmem_limit)))

    out_flat = pl.pallas_call(
        kernel,
        out_shape=jax.ShapeDtypeStruct((B, C_out, HW), x.dtype),
        grid=(B // BB,),
        in_specs=[
            pl.BlockSpec((C_out, 9 * C_in), lambda i: (0, 0)),   # weights (grid-invariant)
            pl.BlockSpec((C_out, 1), lambda i: (0, 0)),          # bias    (grid-invariant)
            pl.BlockSpec((BB, C_in, HW), lambda i: (i, 0, 0)),   # x
        ],
        out_specs=pl.BlockSpec((BB, C_out, HW), lambda i: (i, 0, 0)),
        compiler_params=pltpu.CompilerParams(
            dimension_semantics=("parallel",),   # batch blocks are independent
            vmem_limit_bytes=vmem_limit,
        ),
    )(w2d, b2, x_flat)

    return out_flat.reshape(B, C_out, H, W)


def reference(x, weight, bias):
    """Pure-JAX reference matching the PyTorch ConvBlock forward pass."""
    xp = jnp.pad(x, ((0, 0), (0, 0), (1, 1), (1, 1)), mode="reflect")
    y = jax.lax.conv_general_dilated(
        xp, weight, window_strides=(1, 1), padding="VALID",
        dimension_numbers=("NCHW", "OIHW", "NCHW"),
        precision=jax.lax.Precision.HIGHEST)
    y = y + bias[None, :, None, None]
    return jax.nn.elu(y)


def _run_case(key, B, C_in, C_out, H, W):
    kx, kw, kb = jax.random.split(key, 3)
    x = jax.random.normal(kx, (B, C_in, H, W), dtype=jnp.float32)

    # Conv2d-style init: U(-1/sqrt(fan_in), 1/sqrt(fan_in)), fan_in = C_in*3*3.
    fan_in = C_in * 3 * 3
    bound = 1.0 / (fan_in ** 0.5)
    weight = jax.random.uniform(kw, (C_out, C_in, 3, 3), jnp.float32, -bound, bound)
    bias = jax.random.uniform(kb, (C_out,), jnp.float32, -bound, bound)

    # Round inputs to bf16-representable values so the correctness check is
    # independent of the MXU's f32 precision mode (bf16-pass vs native f32):
    # products are then exact in f32 either way; only summation order differs.
    as_bf16_grid = lambda a: a.astype(jnp.bfloat16).astype(jnp.float32)
    x, weight, bias = map(as_bf16_grid, (x, weight, bias))

    out = jax.block_until_ready(conv_block(x, weight, bias))
    ref = jax.block_until_ready(reference(x, weight, bias))
    assert out.shape == (B, C_out, H, W)
    max_err = float(jnp.max(jnp.abs(out - ref)))
    assert jnp.allclose(out, ref, atol=1e-4, rtol=1e-4), (B, C_in, C_out, H, W, max_err)


if __name__ == "__main__":
    key = jax.random.PRNGKey(0)
    k1, k2 = jax.random.split(key)
    _run_case(k1, B=2, C_in=4, C_out=8, H=16, W=16)   # demo shape (lane-dense H*W)
    _run_case(k2, B=2, C_in=8, C_out=8, H=64, W=2)    # W=2 reflection edge case
    print("KERNEL_OK")
</pallas_src>

<mosaic_0001>
module attributes {stable_mosaic.version = 11 : i64} {
  func.func @_conv3x3_elu_kernel(%arg0: i32, %arg1: memref<8x36xf32, #tpu.memory_space<vmem>>, %arg2: memref<8x1xf32, #tpu.memory_space<vmem>>, %arg3: memref<1x4x256xf32, #tpu.memory_space<vmem>>, %arg4: memref<1x8x256xf32, #tpu.memory_space<vmem>>) attributes {dimension_semantics = [#tpu.dimension_semantics<parallel>], iteration_bounds = array<i64: 2>, scalar_prefetch = 0 : i64, scratch_operands = 0 : i64, tpu.core_type = #tpu.core_type<tc>, window_params = [{pipeline_mode = #tpu.pipeline_mode<synchronous>, transform_indices = @transform_0, window_bounds = array<i64: 8, 36>}, {pipeline_mode = #tpu.pipeline_mode<synchronous>, transform_indices = @transform_1, window_bounds = array<i64: 8, 1>}, {transform_indices = @transform_2, window_bounds = array<i64: 1, 4, 256>}, {transform_indices = @transform_3, window_bounds = array<i64: 1, 8, 256>}]} {
    %c0 = arith.constant 0 : index
    %c0_0 = arith.constant 0 : index
    %0 = vector.load %arg1[%c0, %c0_0] : memref<8x36xf32, #tpu.memory_space<vmem>>, vector<8x36xf32>
    %c0_1 = arith.constant 0 : index
    %c0_2 = arith.constant 0 : index
    %1 = vector.load %arg2[%c0_1, %c0_2] : memref<8x1xf32, #tpu.memory_space<vmem>>, vector<8x1xf32>
    %2 = tpu.iota {dimensions = array<i32: 1>} : vector<1x256xi32>
    %c16_i32 = arith.constant 16 : i32
    %c0_i32 = arith.constant 0 : i32
    %3 = arith.cmpi eq, %c16_i32, %c0_i32 : i32
    %c1_i32 = arith.constant 1 : i32
    %4 = arith.select %3, %c1_i32, %c16_i32 : i32
    %5 = vector.broadcast %4 : i32 to vector<1x256xi32>
    %6 = arith.remsi %2, %5 : vector<1x256xi32>
    %c0_i32_3 = arith.constant 0 : i32
    %7 = vector.broadcast %c0_i32_3 : i32 to vector<1x256xi32>
    %8 = arith.cmpi ne, %6, %7 : vector<1x256xi32>
    %c0_i32_4 = arith.constant 0 : i32
    %9 = vector.broadcast %c0_i32_4 : i32 to vector<1x256xi32>
    %10 = arith.cmpi slt, %6, %9 : vector<1x256xi32>
    %c0_i32_5 = arith.constant 0 : i32
    %11 = arith.cmpi slt, %4, %c0_i32_5 : i32
    %12 = vector.broadcast %11 : i1 to vector<1x256xi1>
    %13 = vector.broadcast %12 : vector<1x256xi1> to vector<1x256xi1>
    %14 = arith.xori %10, %13 : vector<1x256xi1>
    %15 = arith.andi %14, %8 : vector<1x256xi1>
    %16 = vector.broadcast %4 : i32 to vector<1x256xi32>
    %17 = arith.addi %6, %16 : vector<1x256xi32>
    %18 = arith.select %15, %17, %6 : vector<1x256xi1>, vector<1x256xi32>
    %c0_i32_6 = arith.constant 0 : i32
    %19 = vector.broadcast %c0_i32_6 : i32 to vector<1x256xi32>
    %20 = arith.cmpi eq, %18, %19 : vector<1x256xi32>
    %c15_i32 = arith.constant 15 : i32
    %21 = vector.broadcast %c15_i32 : i32 to vector<1x256xi32>
    %22 = arith.cmpi eq, %18, %21 : vector<1x256xi32>
    %c0_7 = arith.constant 0 : index
    %c0_8 = arith.constant 0 : index
    %c0_9 = arith.constant 0 : index
    %23 = vector.load %arg3[%c0_7, %c0_8, %c0_9] : memref<1x4x256xf32, #tpu.memory_space<vmem>>, vector<1x4x256xf32>
    %24 = vector.shape_cast %23 : vector<1x4x256xf32> to vector<4x256xf32>
    %25 = vector.extract_strided_slice %24 {offsets = [0, 16], sizes = [4, 16], strides = [1, 1]} : vector<4x256xf32> to vector<4x16xf32>
    %26 = vector.extract_strided_slice %24 {offsets = [0, 0], sizes = [4, 240], strides = [1, 1]} : vector<4x256xf32> to vector<4x240xf32>
    %27 = tpu.concatenate %25, %26 in 1 : vector<4x16xf32>, vector<4x240xf32> -> vector<4x256xf32>
    %28 = vector.extract_strided_slice %24 {offsets = [0, 16], sizes = [4, 240], strides = [1, 1]} : vector<4x256xf32> to vector<4x240xf32>
    %29 = vector.extract_strided_slice %24 {offsets = [0, 224], sizes = [4, 16], strides = [1, 1]} : vector<4x256xf32> to vector<4x16xf32>
    %30 = tpu.concatenate %28, %29 in 1 : vector<4x240xf32>, vector<4x16xf32> -> vector<4x256xf32>
    %c1_i32_10 = arith.constant 1 : i32
    %31 = tpu.dynamic_rotate %27 by %c1_i32_10 dim 1 : vector<4x256xf32>, i32 -> vector<4x256xf32>
    %c255_i32 = arith.constant 255 : i32
    %32 = tpu.dynamic_rotate %27 by %c255_i32 dim 1 : vector<4x256xf32>, i32 -> vector<4x256xf32>
    %33 = vector.shape_cast %20 : vector<1x256xi1> to vector<1x256xi1>
    %34 = vector.broadcast %33 : vector<1x256xi1> to vector<4x256xi1>
    %35 = arith.select %34, %32, %31 : vector<4x256xi1>, vector<4x256xf32>
    %36 = vector.shape_cast %22 : vector<1x256xi1> to vector<1x256xi1>
    %37 = vector.broadcast %36 : vector<1x256xi1> to vector<4x256xi1>
    %38 = arith.select %37, %31, %32 : vector<4x256xi1>, vector<4x256xf32>
    %c1_i32_11 = arith.constant 1 : i32
    %39 = tpu.dynamic_rotate %24 by %c1_i32_11 dim 1 : vector<4x256xf32>, i32 -> vector<4x256xf32>
    %c255_i32_12 = arith.constant 255 : i32
    %40 = tpu.dynamic_rotate %24 by %c255_i32_12 dim 1 : vector<4x256xf32>, i32 -> vector<4x256xf32>
    %41 = vector.shape_cast %20 : vector<1x256xi1> to vector<1x256xi1>
    %42 = vector.broadcast %41 : vector<1x256xi1> to vector<4x256xi1>
    %43 = arith.select %42, %40, %39 : vector<4x256xi1>, vector<4x256xf32>
    %44 = vector.shape_cast %22 : vector<1x256xi1> to vector<1x256xi1>
    %45 = vector.broadcast %44 : vector<1x256xi1> to vector<4x256xi1>
    %46 = arith.select %45, %39, %40 : vector<4x256xi1>, vector<4x256xf32>
    %c1_i32_13 = arith.constant 1 : i32
    %47 = tpu.dynamic_rotate %30 by %c1_i32_13 dim 1 : vector<4x256xf32>, i32 -> vector<4x256xf32>
    %c255_i32_14 = arith.constant 255 : i32
    %48 = tpu.dynamic_rotate %30 by %c255_i32_14 dim 1 : vector<4x256xf32>, i32 -> vector<4x256xf32>
    %49 = vector.shape_cast %20 : vector<1x256xi1> to vector<1x256xi1>
    %50 = vector.broadcast %49 : vector<1x256xi1> to vector<4x256xi1>
    %51 = arith.select %50, %48, %47 : vector<4x256xi1>, vector<4x256xf32>
    %52 = vector.shape_cast %22 : vector<1x256xi1> to vector<1x256xi1>
    %53 = vector.broadcast %52 : vector<1x256xi1> to vector<4x256xi1>
    %54 = arith.select %53, %47, %48 : vector<4x256xi1>, vector<4x256xf32>
    %55 = tpu.concatenate %35, %27, %38, %43, %24, %46, %51, %30, %54 in 0 : vector<4x256xf32>, vector<4x256xf32>, vector<4x256xf32>, vector<4x256xf32>, vector<4x256xf32>, vector<4x256xf32>, vector<4x256xf32>, vector<4x256xf32>, vector<4x256xf32> -> vector<36x256xf32>
    %cst = arith.constant dense<0.000000e+00> : vector<8x256xf32>
    %56 = tpu.matmul %0, %55, %cst {dimension_numbers = #tpu.dot_dimension_numbers<[1], [0], [0], [1], [0, 0, 1, 1], [], []>} : vector<8x36xf32>, vector<36x256xf32>, vector<8x256xf32> -> vector<8x256xf32>
    %57 = vector.broadcast %1 : vector<8x1xf32> to vector<8x256xf32>
    %58 = arith.addf %56, %57 : vector<8x256xf32>
    %cst_15 = arith.constant 0.000000e+00 : f32
    %59 = vector.broadcast %cst_15 : f32 to vector<8x256xf32>
    %60 = arith.cmpf ogt, %58, %59 : vector<8x256xf32>
    %cst_16 = arith.constant 0.000000e+00 : f32
    %61 = vector.broadcast %cst_16 : f32 to vector<8x256xf32>
    %62 = arith.minimumf %58, %61 : vector<8x256xf32>
    %63 = math.exp %62 : vector<8x256xf32>
    %cst_17 = arith.constant 1.000000e+00 : f32
    %64 = vector.broadcast %cst_17 : f32 to vector<8x256xf32>
    %65 = arith.subf %63, %64 : vector<8x256xf32>
    %66 = arith.select %60, %58, %65 : vector<8x256xi1>, vector<8x256xf32>
    %c0_18 = arith.constant 0 : index
    %c0_19 = arith.constant 0 : index
    %c0_20 = arith.constant 0 : index
    %67 = vector.load %arg4[%c0_18, %c0_19, %c0_20] : memref<1x8x256xf32, #tpu.memory_space<vmem>>, vector<1x8x256xf32>
    %68 = vector.shape_cast %67 : vector<1x8x256xf32> to vector<8x256xf32>
    %69 = vector.shape_cast %66 : vector<8x256xf32> to vector<1x8x256xf32>
    tpu.vector_store %arg4[%c0_18, %c0_19, %c0_20], %69 {strides = array<i32>} : memref<1x8x256xf32, #tpu.memory_space<vmem>>, vector<1x8x256xf32>,
    return
  }
  func.func @transform_0(%arg0: i32) -> (i32, i32) {
    %c0_i32 = arith.constant 0 : i32
    %c0_i32_0 = arith.constant 0 : i32
    %c0_i32_1 = arith.constant 0 : i32
    return %c0_i32, %c0_i32_0 : i32, i32
  }
  func.func @transform_1(%arg0: i32) -> (i32, i32) {
    %c0_i32 = arith.constant 0 : i32
    %c0_i32_0 = arith.constant 0 : i32
    %c0_i32_1 = arith.constant 0 : i32
    return %c0_i32, %c0_i32_0 : i32, i32
  }
  func.func @transform_2(%arg0: i32) -> (i32, i32, i32) {
    %c0_i32 = arith.constant 0 : i32
    %c0_i32_0 = arith.constant 0 : i32
    %c0_i32_1 = arith.constant 0 : i32
    return %arg0, %c0_i32, %c0_i32_0 : i32, i32, i32
  }
  func.func @transform_3(%arg0: i32) -> (i32, i32, i32) {
    %c0_i32 = arith.constant 0 : i32
    %c0_i32_0 = arith.constant 0 : i32
    %c0_i32_1 = arith.constant 0 : i32
    return %arg0, %c0_i32, %c0_i32_0 : i32, i32, i32
  }
}

</mosaic_0001>

<bundles_post_ra>
// kernel: tpu_custom_call.1
= control target key start
LH: loop header
LB: loop body
LE: loop exit
PB: predicated region body
PF: predicated region fallthrough
CT: control target
= control target key end

     0   :  { %8 = vsyncpa [#allocation3], 0  ;;  %s966_s0 = inlined_call_operand.vmem [shape: f32[8,36], index: 0, kind: input, shape index: {}]   ;;  %s967_s1 = inlined_call_operand.vmem [shape: f32[8,1], index: 1, kind: input, shape index: {}]   ;;  %s968_s2 = inlined_call_operand.hbm [shape: f32[2,4,256], index: 2, kind: input, shape index: {}]   ;;  %s969_s3 = inlined_call_operand.hbm [shape: f32[2,8,256], index: 3, kind: output, shape index: {}]  }
   0x1   :  { %10 = vsyncpa [#allocation3 + $0x1], 0 }
   0x2   :  { %11 = vsyncpa [#allocation4], 0 }
   0x3   :  { %13 = vsyncpa [#allocation4 + $0x1], 0  ;;  %s719_s12 = smov 0   ;;  %s721_s13 = smov 0  }
   0x4   :  { %s723_s14 = smov 0   ;;  %s725_s15 = smov 0  }
   0x5 LB: > { %s740_s16 = sadd.s32 4294967295, %s689_s15   ;;  %s518_s17 = sadd.s32 4294967294, %s689_s15   ;;  %s689_s15 = sphi %s725_s15, %s994_s15   ;;  %s685_s14 = sphi %s723_s14, %s993_s14   ;;  %s681_s13 = sphi %s721_s13, %s992_s13   ;;  %s677_s12 = sphi %s719_s12, %s991_s12  }
   0x6   : > { %s744_s18 = sadd.s32 1, %s689_s15   ;;  %s68_s19 = sadd.s32 1, %s685_s14 }
   0x7   : > { %s65_s20 = ssub.s32 %s689_s15, %s744_s18  ;;  %p75_p0 = scmp.ne.s32.totalorder %s685_s14, %s681_s13 }
   0x8   : > { %p66_p1 = scmp.eq.s32.totalorder %s65_s20, 0  ;;  %p76_p2 = scmp.eq.s32.totalorder %s689_s15, 0 }
   0x9   : > { %p81_p3 = scmp.ne.s32.totalorder %s681_s13, %s677_s12  ;;  %p82_p4 = scmp.eq.s32.totalorder %s740_s16, 0 }
   0xa   : > { %s756_s21 = scalar_select %p66_p1, %s685_s14, %s68_s19  }
   0xb   : > { %p758_p5 = por %p76_p2, %p75_p0  ;;  %p762_p6 = por %p82_p4, %p81_p3 }
   0xc   : > { %p105_p7 = scmp.eq.s32.totalorder %s740_s16, 1  ;;  %p111_p8 = scmp.eq.s32.totalorder %s518_s17, 1 }
   0xd   : > { %s973_s23 = scalar_select %p762_p6, 1, 0 }
   0xe   : > { %p551_p10 = scmp.lt.s32.totalorder %s689_s15, 2  ;;  %p769_p11 = por %p105_p7, %p75_p0 }
   0xf   : > { %p773_p12 = por %p111_p8, %p81_p3  ;;  %s137_s26 = sand.u32 1, %s685_s14  }
  0x10   : > { %s974_s24 = scalar_select %p769_p11, 1, 0 }
  0x11   : > { %s975_s25 = scalar_select %p773_p12, 1, 0 }
  0x12   : > { %s537_s27 = sshll.u32 %s689_s15, 7  ;;  %s521_s28 = sshll.u32 %s137_s26, 3 }
  0x13   : > { %s782_s4 = scalar_lea.hbm %s968_s2, %s537_s27  ;;  %s141_s5 = scalar_lea.vmem [#allocation2], %s521_s28 }
  0x14   : > { %s149_s6 = sshll.u32 %s141_s5, 4  ;;  %p786_p13 = pnand %p551_p10, %p758_p5  ;;  %s790_s6 = int_to_ptr.vmem [resolvable:$true] %s149_s6 }
  0x15   : > { %s138_s8 = scalar_lea.sflag [#allocation3], %s137_s26  ;;  %s597_s9 = scalar_lea.hbm %s782_s4, 128 }
  0x16   : > { %p598_p2 = scmp.ne.s32.totalorder %s782_s4, %s597_s9  ;;  %p599_p3 = pneg %p786_p13 }
  0x17   : > { %s602_s17 = scalar_lea.hbm %s968_s2, 256  ;;  %p603_p5 = scmp.lt.s32.totalorder %s782_s4, %s968_s2 }
  0x18   : > { %p600_p4 = pnand %p599_p3, %p598_p2  ;;  %p604_p8 = scmp.lt.s32.totalorder %s602_s17, %s597_s9 }
  0x1a   : > { %p601_p7 = pneg %p600_p4  ;;  %p605_p10 = por %p604_p8, %p603_p5 }
  0x1c   : > { %p606_p9 = pnand %p605_p10, %p601_p7 }
  0x1e   : > { %609 = shalt.err (!%p606_p9)
}
  0x1f   : > { %s610_s22 = scalar_lea.vmem %s790_s6, 128  ;;  %s691_s26 = smov [#allocation2]  }
  0x20   : > { %p611_p0 = scmp.ne.s32.totalorder %s790_s6, %s610_s22  ;;  %s615_s27 = sshll.u32 %s691_s26, 4  ;;  %s616_s27 = int_to_ptr.vmem [resolvable:$false] %s615_s27 }
  0x21   : > { %s617_s28 = scalar_lea.vmem %s616_s27, 256  ;;  %p618_p4 = scmp.lt.s32.totalorder %s790_s6, %s616_s27 }
  0x22   : > { %p613_p1 = pnand %p611_p0, %p599_p3  ;;  %p619_p12 = scmp.lt.s32.totalorder %s617_s28, %s610_s22 }
  0x24   : > { %p614_p2 = pneg %p613_p1  ;;  %p620_p11 = por %p619_p12, %p618_p4 }
  0x26   : > { %p621_p6 = pnand %p620_p11, %p614_p2 }
  0x28   : > { %624 = shalt.err (!%p621_p6)
}
  0x29   : > { %546 = dma.hbm_to_vmem [thread:$0]  (!%p786_p13), %s782_s4, 128, %s790_s6, %s138_s8  }
  0x2a   : > { %p977_p9 = scmp.lt.s32.totalorder %s689_s15, 3  ;;  %p978_p7 = scmp.ge.s32.totalorder %s689_s15, 1 }
  0x2c   : > { %p155_p0 = pnand %p978_p7, %p977_p9 }
  0x2d   : > { %s817_s29 = sand.u32 (!%p155_p0), 1, %s681_s13   ;;  %p979_p6 = scmp.ne.s32.totalorder (!%p155_p0), %s973_s23, 0 }
  0x2e   : > { %158 = sbr.rel (%p155_p0) target bundleno = 538 (0x21a), region = 32  ;;  %s525_s30 = sshll.u32 (!%p155_p0), %s817_s29, 3 }
  0x2f   : > { %s161_s5 = scalar_lea.sflag (!%p155_p0), [#allocation3], %s817_s29  ;;  %s164_s9 = scalar_lea.vmem (!%p155_p0), [#allocation2], %s525_s30 }
  0x33   : > { %668 = dma.done.wait (%p979_p6), %s161_s5, 128  }
  0x34   : > { %670 = vsyncadd (%p979_p6), %s161_s5, 4294967168  ;;  %v825_v0 = vld [vmem:[%s164_s9] sm:$0xff]  ;;  %s692_s4 = smov 112   ;;  %s693_s6 = smov 16   ;;  %vm237_vm0 = vcmask 916480   ;;  %vm230_vm1 = vcmask 130048   ;;  %v189_v13 = vlaneseq }
  0x35   : > { %222 = vrot.lane.b32.xlu0 %v825_v0, %s692_s4  ;;  %v830_v1 = vcombine.high %v825_v0, %v825_v0  ;;  %s694_s7 = smov 1   ;;  %s695_s23 = smov 127   ;;  %v696_v9 = vmov 0.0   ;;  %v697_v11 = vmov 0   ;;  %v188_v12 = vld [vmem:[%s967_s1] sm:$0xff]  ;;  %vm324_vm8 = vcmask 1043456  }
  0x36   : > { %412 = vmatprep.mubr.f32.mxu0 %v696_v9  ;;  %591 = vset.pattern.permute.xlu0 %v697_v11  ;;  %v190_v14 = vand.u32 127, %v189_v13  ;;  %v187_v11 = vld [vmem:[%s966_s0] sm:$0xff]  ;;  %vm338_vm9 = vcmask 293888   ;;  %s526_s19 = sshll.u32 %s817_s29, 4  ;;  %s538_s20 = sshll.u32 %s740_s16, 8 }
  0x37   : > { %235 = vrot.lane.b32.xlu1 %v830_v1, %s692_s4  ;;  %s186_s22 = scalar_lea.vmem [#allocation5], %s526_s19  ;;  %s929_s30 = scalar_lea.hbm %s969_s3, %s538_s20 }
  0x38   : > { %v191_v17 = vadd.s32 128, %v190_v14  ;;  %vm247_vm2 = vcmp.lt.s32.totalorder %v190_v14, 1  ;;  %vm254_vm3 = vcmp.lt.s32.totalorder %v190_v14, 127  ;;  %v196_v21 = vand.u32 15, %v190_v14  ;;  %s448_s26 = sshll.u32 %s186_s22, 4  ;;  %s434_s5 = scalar_lea.sflag [#allocation4], %s817_s29  ;;  %s449_s26 = int_to_ptr.vmem [resolvable:$true] %s448_s26 }
  0x39   : > { %228 = vrot.lane.b32.xlu0 %v830_v1, %s693_s6  ;;  %s625_s9 = scalar_lea.vmem %s449_s26, 256  ;;  %p988_p12 = scmp.ne.s32.totalorder %s974_s24, 0 }
  0x3a   : > { %v203_v18 = vand.u32 15, %v191_v17  ;;  %vm861_vm5 = vcmp.eq.s32.totalorder %v196_v21, 15  ;;  %vm868_vm6 = vcmp.eq.s32.totalorder %v196_v21, 0  ;;  %p626_p11 = scmp.ne.s32.totalorder %s449_s26, %s625_s9  ;;  %s698_s16 = smov [#allocation5]  }
  0x3b   : > { %226 = vrot.lane.b32.xlu1 %v825_v0, %s693_s6  ;;  %s629_s4 = sshll.u32 %s698_s16, 4  ;;  %s630_s4 = int_to_ptr.vmem [resolvable:$false] %s629_s4 }
  0x3c   : > { %vm856_vm4 = vcmp.eq.s32.totalorder %v203_v18, 15  ;;  %vm872_vm7 = vcmp.eq.s32.totalorder %v203_v18, 0  ;;  %p627_p13 = pnand %p626_p11, %p988_p12  ;;  %s631_s6 = scalar_lea.vmem %s630_s4, 512 }
  0x3d   : > { %270 = vrot.lane.b32.xlu0 %v825_v0, %s694_s7  ;;  %p632_p3 = scmp.lt.s32.totalorder %s449_s26, %s630_s4  ;;  %p633_p5 = scmp.lt.s32.totalorder %s631_s6, %s625_s9 }
  0x3e   : > { %p628_p1 = pneg %p627_p13 }
  0x3f   : > { %272 = vrot.lane.b32.xlu1 %v830_v1, %s694_s7  ;;  %p634_p8 = por %p633_p5, %p632_p3 }
  0x41   : > { %276 = vrot.lane.b32.xlu0 %v825_v0, %s695_s23  ;;  %p635_p10 = pnand %p634_p8, %p628_p1 }
  0x43   : > { %278 = vrot.lane.b32.xlu1 %v830_v1, %s695_s23 }
  0xa7   : > { %v223_v2 = vpop.permute.xlu0 %222 }
  0xa9   : > { %v236_v3 = vpop.permute.xlu1 %235 }
  0xaa   : > { %v839_v4 = vsel %vm237_vm0, %v223_v2, %v236_v3 }
  0xab   : > { %286 = vrot.lane.b32.xlu0 %v839_v4, %s694_s7  ;;  %v229_v5 = vpop.permute.xlu0 %228  ;;  %v320_v47 = vrot.slane %v839_v4, 4 }
  0xac   : > { %v242_v6 = vsel %vm237_vm0, %v236_v3, %v229_v5 }
  0xad   : > { %288 = vrot.lane.b32.xlu1 %v242_v6, %s694_s7  ;;  %v227_v7 = vpop.permute.xlu1 %226  ;;  %v321_v34 = vrot.slane %v242_v6, 4 }
  0xae   : > { %v843_v8 = vsel %vm230_vm1, %v223_v2, %v227_v7  ;;  %v846_v10 = vsel %vm230_vm1, %v227_v7, %v229_v5 }
  0xaf   : > { %292 = vrot.lane.b32.xlu0 %v839_v4, %s695_s23  ;;  %v271_v15 = vpop.permute.xlu0 %270  ;;  %v304_v3 = vrot.slane %v846_v10, 4  ;;  %v303_v7 = vrot.slane %v843_v8, 4 }
  0xb1   : > { %294 = vrot.lane.b32.xlu1 %v242_v6, %s695_s23  ;;  %v273_v16 = vpop.permute.xlu1 %272 }
  0xb2   : > { %v274_v22 = vsel %vm247_vm2, %v271_v15, %v273_v16  ;;  %v275_v27 = vsel %vm247_vm2, %v273_v16, %v271_v15 }
  0xb3   : > { %243 = vrot.lane.b32.xlu0 %v843_v8, %s694_s7  ;;  %v277_v19 = vpop.permute.xlu0 %276 }
  0xb5   : > { %245 = vrot.lane.b32.xlu1 %v846_v10, %s694_s7  ;;  %v279_v20 = vpop.permute.xlu1 %278 }
  0xb6   : > { %v281_v23 = vsel %vm254_vm3, %v279_v20, %v277_v19  ;;  %v280_v29 = vsel %vm254_vm3, %v277_v19, %v279_v20 }
  0xb7   : > { %250 = vrot.lane.b32.xlu0 %v843_v8, %s695_s23  ;;  %v285_v30 = vsel %vm856_vm4, %v274_v22, %v281_v23  ;;  %v284_v35 = vsel %vm861_vm5, %v275_v27, %v280_v29  ;;  %v282_v51 = vsel %vm868_vm6, %v280_v29, %v275_v27  ;;  %v283_v52 = vsel %vm872_vm7, %v281_v23, %v274_v22 }
  0xb8   : > { %v316_v37 = vrot.slane %v285_v30, 4  ;;  %v315_v48 = vrot.slane %v284_v35, 4  ;;  %v309_v56 = vrot.slane %v282_v51, 4  ;;  %v310_v57 = vrot.slane %v283_v52, 4 }
  0xb9   : > { %252 = vrot.lane.b32.xlu1 %v846_v10, %s695_s23 }
  0xba   : > { %v330_v54 = vsel %vm324_vm8, %v830_v1, %v316_v37  ;;  %v329_v55 = vsel %vm324_vm8, %v825_v0, %v315_v48 }
  0xbb   : > { %335 = vperm.xlu0 %591, %v188_v12  }
 0x11d   : > { %v287_v24 = vpop.permute.xlu0 %286 }
 0x11f   : > { %v289_v26 = vpop.permute.xlu1 %288 }
 0x120   : > { %v290_v38 = vsel %vm247_vm2, %v287_v24, %v289_v26  ;;  %v291_v39 = vsel %vm247_vm2, %v289_v26, %v287_v24 }
 0x121   : > { %v293_v31 = vpop.permute.xlu0 %292 }
 0x123   : > { %v295_v36 = vpop.permute.xlu1 %294 }
 0x124   : > { %v296_v40 = vsel %vm254_vm3, %v293_v31, %v295_v36  ;;  %v297_v41 = vsel %vm254_vm3, %v295_v36, %v293_v31 }
 0x125   : > { %v244_v42 = vpop.permute.xlu0 %243  ;;  %v301_v43 = vsel %vm856_vm4, %v290_v38, %v297_v41  ;;  %v300_v44 = vsel %vm861_vm5, %v291_v39, %v296_v40  ;;  %v299_v45 = vsel %vm872_vm7, %v297_v41, %v290_v38  ;;  %v298_v46 = vsel %vm868_vm6, %v296_v40, %v291_v39 }
 0x126   : > { %527 = vmatprep.subr.msk.mxu0 %vm324_vm8, %v301_v43  ;;  %v332_v49 = vsel %vm324_vm8, %v299_v45, %v321_v34  ;;  %v331_v53 = vsel %vm324_vm8, %v298_v46, %v320_v47 }
 0x127   : > { %v246_v50 = vpop.permute.xlu1 %245  ;;  %528 = vmatpush1.msk.msra.mxu0 %vm324_vm8, %v300_v44 }
 0x128   : > { %372 = vmatprep.subr.mxu0 %v332_v49  ;;  %v248_v60 = vsel %vm247_vm2, %v244_v42, %v246_v50  ;;  %v249_v61 = vsel %vm247_vm2, %v246_v50, %v244_v42 }
 0x129   : > { %373 = vmatpush1.msra.mxu0 %v331_v53  ;;  %v251_v58 = vpop.permute.xlu0 %250 }
 0x12a   : > { %374 = vmatprep.subr.mxu0 %v330_v54 }
 0x12b   : > { %v253_v59 = vpop.permute.xlu1 %252  ;;  %375 = vmatpush1.msra.mxu0 %v329_v55 }
 0x12c   : > { %v255_v62 = vsel %vm254_vm3, %v251_v58, %v253_v59  ;;  %v256_v63 = vsel %vm254_vm3, %v253_v59, %v251_v58 }
 0x12d   : > { %v268_v1 = vsel %vm856_vm4, %v248_v60, %v256_v63  ;;  %v267_v2 = vsel %vm861_vm5, %v249_v61, %v255_v62  ;;  %v262_v0 = vsel %vm872_vm7, %v256_v63, %v248_v60  ;;  %v261_v6 = vsel %vm868_vm6, %v255_v62, %v249_v61 }
 0x12e   : > { %v328_v4 = vsel %vm324_vm8, %v268_v1, %v310_v57  ;;  %v327_v5 = vsel %vm324_vm8, %v267_v2, %v309_v56  ;;  %v326_v9 = vsel %vm324_vm8, %v262_v0, %v304_v3  ;;  %v325_v10 = vsel %vm324_vm8, %v261_v6, %v303_v7 }
 0x12f   : > { %376 = vmatprep.subr.mxu0 %v328_v4 }
 0x130   : > { %377 = vmatpush1.msra.mxu0 %v327_v5 }
 0x131   : > { %378 = vmatprep.subr.mxu0 %v326_v9 }
 0x132   : > { %379 = vmatpush1.msra.mxu0 %v325_v10 }
 0x133   : > { %529 = vmatmul.mubr.msk.f32.vlgmr.msra.gmra.mxu0 %vm338_vm9, %v187_v11 }
 0x136   : > { %v336_v12 = vpop.permute.xlu0 %335 }
 0x1f3   : > { %v414_v13 = vpop.f32.mrf.mxu0 }
 0x1f4   : > { %v415_v14 = vadd.f32 %v414_v13, %v336_v12 }
 0x1f5   : > { %v416_v8 = vpop.f32.mrf.mxu0 }
 0x1f6   : > { %v421_v15 = vmin.f32 %v415_v14, 0.0  ;;  %v417_v16 = vadd.f32 %v416_v8, %v336_v12  ;;  %vm419_vm10 = vcmp.gt.f32.partialorder %v415_v14, 0.0 }
 0x1f8   : > { %v423_v17 = vmul.f32 1.442695, %v421_v15  ;;  %v422_v18 = vmin.f32 %v417_v16, 0.0  ;;  %vm420_vm11 = vcmp.gt.f32.partialorder %v417_v16, 0.0 }
 0x1fa   : > { %593 = vpow2.f32 %v423_v17  ;;  %v425_v19 = vmul.f32 1.442695, %v422_v18 }
 0x1fc   : > { %595 = vpow2.f32 %v425_v19 }
 0x207   : > { %v594_v20 = vpop.eup %593 }
 0x208   : > { %v530_v21 = vadd.f32 -1.0, %v594_v20 }
 0x209   : > { %v596_v22 = vpop.eup %595 }
 0x20a   : > { %v429_v23 = vsel %vm419_vm10, %v415_v14, %v530_v21  ;;  %v531_v24 = vadd.f32 -1.0, %v596_v22 }
 0x20b   : > { %431 = vst [vmem:[%s186_s22] sm:$0xff] %v429_v23 }
 0x20c   : > { %v430_v25 = vsel %vm420_vm11, %v417_v16, %v531_v24 }
 0x20d   : > { %432 = vst [vmem:[%s186_s22 + $0x8] sm:$0xff] %v430_v25 }
 0x20e   : > { %638 = shalt.err (!%p635_p10)
}
 0x20f   : > { %s639_s7 = scalar_lea.hbm %s929_s30, 256  ;;  %s643_s8 = scalar_lea.hbm %s969_s3, 512 }
 0x210   : > { %p640_p2 = scmp.ne.s32.totalorder %s929_s30, %s639_s7  ;;  %p644_p7 = scmp.lt.s32.totalorder %s929_s30, %s969_s3 }
 0x211   : > { %p645_p0 = scmp.lt.s32.totalorder %s643_s8, %s639_s7 }
 0x212   : > { %p641_p4 = pnand %p640_p2, %p988_p12 }
 0x213   : > { %p646_p6 = por %p645_p0, %p644_p7 }
 0x214   : > { %p642_p9 = pneg %p641_p4 }
 0x216   : > { %p647_p11 = pnand %p646_p6, %p642_p9 }
 0x218   : > { %650 = shalt.err (!%p647_p11)
}
 0x219   : > { %541 = dma.vmem_to_hbm [thread:$0]  (%p988_p12), %s449_s26, 256, %s929_s30, %s434_s5  }
 0x21a PF: > { %s460_s17 = sand.u32 1, %s677_s12   ;;  %p989_p13 = scmp.ne.s32.totalorder %s975_s25, 0 }
 0x21b   : > { %p990_p1 = scmp.ge.s32.totalorder %s689_s15, 2  ;;  %s461_s19 = scalar_lea.sflag [#allocation4], %s460_s17 }
 0x21d   : > { %p548_p3 = pnand %p990_p1, %p989_p13 }
 0x21f   : > { %p549_p5 = pneg %p548_p3 }
 0x221   : > { %672 = dma.done.wait (%p549_p5), %s461_s19, 256  }
 0x222   : > { %674 = vsyncadd (%p549_p5), %s461_s19, 4294967040  ;;  %p16_p8 = scmp.ge.s32.totalorder %s744_s18, 4   ;;  %s991_s12 = smov %s681_s13 }
 0x223   : > { %s992_s13 = smov %s685_s14  ;;  %s993_s14 = smov %s756_s21 }
 0x224   : > { %s994_s15 = smov %s744_s18  ;;  %18 = sbr.rel (!%p16_p8) target bundleno = 5 (0x5), region = 77 }
 0x229   :  { %466 = vsyncpa [#allocation3], 1 }
 0x22a   :  { %468 = vsyncpa [#allocation3 + $0x1], 1 }
 0x22b   :  { %469 = vsyncpa [#allocation4], 1 }
 0x22c   :  { %471 = vsyncpa [#allocation4 + $0x1], 1 }

</bundles_post_ra>
